<compile_context>
chip_gen: v6e
topology: v6e:2x2x1
jax: 0.10.0
libtpu: 0.0.40
codegen_flags: <defaults>
</compile_context>

<pallas_src>
import functools
import math

import jax
import jax.numpy as jnp
from jax.experimental import pallas as pl
from jax.experimental.pallas import tpu as pltpu


_NEG_INF = -1e30   # finite "minus infinity": keeps max/exp free of inf/nan
_VMEM_LIMIT = 32 * 1024 * 1024


def _pick_tile(dim, candidates):
    """Largest candidate tile that divides `dim`, else the full dim."""
    # TODO(synk): add explicit padding / remainder tiles for awkward dims that
    # none of the candidates divide (currently falls back to one full-dim tile).
    for c in candidates:
        if c <= dim and dim % c == 0:
            return c
    return dim


# ----------------------------------------------------------------------------
# Tiled matmul kernel (fused qkv projection / c_proj)
# ----------------------------------------------------------------------------
def _matmul_kernel(x_ref, w_ref, o_ref, acc_ref):
    @pl.when(pl.program_id(2) == 0)
    def _():
        acc_ref[...] = jnp.zeros_like(acc_ref)

    acc_ref[...] += jnp.dot(x_ref[...], w_ref[...],
                            preferred_element_type=jnp.float32)

    @pl.when(pl.program_id(2) == pl.num_programs(2) - 1)
    def _():
        o_ref[...] = acc_ref[...].astype(o_ref.dtype)


def linear_pallas(x2d, w_t, *, matmul_dtype=None):
    """y = x2d @ w_t with x2d:(M,K), w_t:(K,N).  Tiled, pipelined, f32 accum."""
    M, K = x2d.shape
    K2, N = w_t.shape
    assert K == K2
    out_dtype = x2d.dtype
    if matmul_dtype is not None:              # e.g. jnp.bfloat16 on v5e/v6e/v7x
        x2d = x2d.astype(matmul_dtype)
        w_t = w_t.astype(matmul_dtype)

    tm = _pick_tile(M, (512, 256, 128))
    tn = _pick_tile(N, (512, 256, 128))
    tk = _pick_tile(K, (512, 256, 128))
    grid = (M // tm, N // tn, K // tk)

    return pl.pallas_call(
        _matmul_kernel,
        out_shape=jax.ShapeDtypeStruct((M, N), out_dtype),
        grid=grid,
        in_specs=[
            pl.BlockSpec((tm, tk), lambda i, j, k: (i, k)),
            pl.BlockSpec((tk, tn), lambda i, j, k: (k, j)),
        ],
        out_specs=pl.BlockSpec((tm, tn), lambda i, j, k: (i, j)),
        scratch_shapes=[pltpu.VMEM((tm, tn), jnp.float32)],
        compiler_params=pltpu.CompilerParams(
            dimension_semantics=("parallel", "parallel", "arbitrary"),
            vmem_limit_bytes=_VMEM_LIMIT),
    )(x2d, w_t)


# ----------------------------------------------------------------------------
# RoPE + scale pre-pass (elementwise, O(T) -- removes tables from attention)
# ----------------------------------------------------------------------------
def _pair_swap(x):
    """out[..., 2p] = x[..., 2p+1]; out[..., 2p+1] = x[..., 2p]."""
    nxt = jnp.roll(x, -1, axis=-1)   # nxt[..., i] = x[..., i+1]
    prv = jnp.roll(x, 1, axis=-1)    # prv[..., i] = x[..., i-1]
    lane = jax.lax.broadcasted_iota(jnp.int32, x.shape, x.ndim - 1)
    return jnp.where(lane % 2 == 0, nxt, prv)


def _rope_scale_kernel(x_ref, cos_ref, sin_ref, o_ref):
    x = x_ref[0].astype(jnp.float32)
    out = x * cos_ref[...] + _pair_swap(x) * sin_ref[...]
    o_ref[0] = out.astype(o_ref.dtype)


def rope_scale_pallas(x, cos_tbl, sin_tbl, *, out_dtype=None):
    """Apply interleaved-pair RoPE with per-channel scale folded into tables."""
    B, T, C = x.shape
    out_dtype = out_dtype if out_dtype is not None else x.dtype
    tt = _pick_tile(T, (512, 256, 128))
    grid = (B, T // tt)
    return pl.pallas_call(
        _rope_scale_kernel,
        out_shape=jax.ShapeDtypeStruct((B, T, C), out_dtype),
        grid=grid,
        in_specs=[
            pl.BlockSpec((1, tt, C), lambda b, ti: (b, ti, 0)),
            pl.BlockSpec((tt, C), lambda b, ti: (ti, 0)),
            pl.BlockSpec((tt, C), lambda b, ti: (ti, 0)),
        ],
        out_specs=pl.BlockSpec((1, tt, C), lambda b, ti: (b, ti, 0)),
        compiler_params=pltpu.CompilerParams(
            dimension_semantics=("parallel", "parallel"),
            vmem_limit_bytes=_VMEM_LIMIT),
    )(x, cos_tbl, sin_tbl)


# ----------------------------------------------------------------------------
# Flash attention kernel (causal; q/k already rotated & scaled; lane-dense)
# ----------------------------------------------------------------------------
def _flash_attn_kernel(q_ref, k_ref, v_ref, o_ref, m_ref, l_ref, acc_ref,
                       *, n_heads, dh, tq, tkv, dot_dtype, approx_recip):
    qi = pl.program_id(1)
    ki = pl.program_id(2)

    @pl.when(ki == 0)
    def _init():
        m_ref[...] = jnp.full(m_ref.shape, _NEG_INF, jnp.float32)
        l_ref[...] = jnp.zeros_like(l_ref)
        acc_ref[...] = jnp.zeros_like(acc_ref)

    # Causal tile skipping: kv tile entirely above the diagonal -> no compute.
    # (The k/v index_maps are clamped so these iterations also issue no DMA.)
    @pl.when(ki * tkv <= qi * tq + (tq - 1))
    def _compute():
        q = q_ref[0]     # (tq, C)  pre-rotated + scaled (+ sm_scale folded)
        k = k_ref[0]     # (tkv, C) pre-rotated + scaled
        v = v_ref[0]     # (tkv, C)

        # Only diagonal tiles need the causal mask; interior tiles skip the
        # iota/compare/select VPU passes entirely.
        needs_mask = (ki * tkv + tkv - 1) > (qi * tq)

        def _apply_mask(s):
            row = qi * tq + jax.lax.broadcasted_iota(jnp.int32, (tq, tkv), 0)
            col = ki * tkv + jax.lax.broadcasted_iota(jnp.int32, (tq, tkv), 1)
            return jnp.where(col <= row, s, _NEG_INF)

        m_prev_all = m_ref[...]     # (tq, n_heads) -- one column per head
        l_prev_all = l_ref[...]     # (tq, n_heads)

        pv_parts, alpha_parts, m_parts, l_parts = [], [], [], []
        for h in range(n_heads):
            sl = slice(h * dh, (h + 1) * dh)
            s = jax.lax.dot_general(
                q[:, sl], k[:, sl], (((1,), (1,)), ((), ())),
                preferred_element_type=jnp.float32)            # (tq, tkv) f32
            s = jax.lax.cond(needs_mask, _apply_mask, lambda t: t, s)

            m_prev = m_prev_all[:, h:h + 1]                    # (tq, 1)
            m_new = jnp.maximum(m_prev, jnp.max(s, axis=-1, keepdims=True))
            alpha = jnp.exp(m_prev - m_new)                    # (tq, 1) narrow
            p = jnp.exp(s - m_new)                             # (tq, tkv) f32
            l_new = alpha * l_prev_all[:, h:h + 1] + jnp.sum(
                p, axis=-1, keepdims=True)                     # (tq, 1)

            pv = jnp.dot(p.astype(dot_dtype), v[:, sl],
                         preferred_element_type=jnp.float32)   # (tq, dh)

            pv_parts.append(pv)
            alpha_parts.append(jnp.broadcast_to(alpha, (tq, dh)))
            m_parts.append(m_new)
            l_parts.append(l_new)

        # ONE dense (tq, C) accumulator update; narrow m/l stores.
        alpha_full = jnp.concatenate(alpha_parts, axis=-1)     # (tq, C)
        pv_full = jnp.concatenate(pv_parts, axis=-1)           # (tq, C)
        acc_ref[...] = alpha_full * acc_ref[...] + pv_full
        m_ref[...] = jnp.concatenate(m_parts, axis=-1)         # (tq, n_heads)
        l_ref[...] = jnp.concatenate(l_parts, axis=-1)

    @pl.when(ki == pl.num_programs(2) - 1)
    def _finalize():
        l = l_ref[...]                                         # (tq, n_heads)
        if approx_recip:
            inv = pl.reciprocal(l, approx=True)
        else:
            inv = 1.0 / l
        inv_full = jnp.concatenate(
            [jnp.broadcast_to(inv[:, h:h + 1], (tq, dh)) for h in range(n_heads)],
            axis=-1)                                           # (tq, C)
        o_ref[0] = (acc_ref[...] * inv_full).astype(o_ref.dtype)


def flash_attention_pallas(q, k, v, n_heads, *, out_dtype=None,
                           dot_dtype=None, approx_recip=False):
    B, T, C = q.shape
    dh = C // n_heads
    out_dtype = out_dtype if out_dtype is not None else q.dtype
    dot_dtype = dot_dtype if dot_dtype is not None else q.dtype
    tq = _pick_tile(T, (256, 128))
    tkv = _pick_tile(T, (256, 128))
    grid = (B, T // tq, T // tkv)

    def kv_index_map(b, qi, ki):
        # Clamp above-diagonal kv tiles to the last valid kv block for this
        # q tile: the block index then stays constant across the skipped
        # iterations, so the pipeline issues no new K/V DMA for them.
        return (b, jnp.minimum(ki, ((qi + 1) * tq - 1) // tkv), 0)

    kern = functools.partial(
        _flash_attn_kernel, n_heads=n_heads, dh=dh, tq=tq, tkv=tkv,
        dot_dtype=dot_dtype, approx_recip=approx_recip)

    # NOTE: if the K/V fetch becomes exposed after the causal-DMA clamp, a
    # third buffer (pipeline_mode=pl.Buffered(3)) on the k/v specs can hide it.
    return pl.pallas_call(
        kern,
        out_shape=jax.ShapeDtypeStruct((B, T, C), out_dtype),
        grid=grid,
        in_specs=[
            pl.BlockSpec((1, tq, C), lambda b, qi, ki: (b, qi, 0)),
            pl.BlockSpec((1, tkv, C), kv_index_map),
            pl.BlockSpec((1, tkv, C), kv_index_map),
        ],
        out_specs=pl.BlockSpec((1, tq, C), lambda b, qi, ki: (b, qi, 0)),
        scratch_shapes=[
            pltpu.VMEM((tq, n_heads), jnp.float32),  # running max (1 col/head)
            pltpu.VMEM((tq, n_heads), jnp.float32),  # running denom
            pltpu.VMEM((tq, C), jnp.float32),        # accumulator
        ],
        compiler_params=pltpu.CompilerParams(
            dimension_semantics=("parallel", "parallel", "arbitrary"),
            vmem_limit_bytes=_VMEM_LIMIT),
    )(q, k, v)


# ----------------------------------------------------------------------------
# Parameter setup / tables / forward (plain JAX glue)
# ----------------------------------------------------------------------------
def l2_normalize_rows(w, eps=1e-6):
    # matches F.normalize(w, dim=-1, p=2, eps=eps) with groups=1, norm_eps=0
    n = jnp.linalg.norm(w, axis=-1, keepdims=True)
    return w / jnp.maximum(n, eps)


def make_params(key, n_embd):
    ks = jax.random.split(key, 5)
    init = lambda k: l2_normalize_rows(
        jax.random.normal(k, (n_embd, n_embd), jnp.float32)
        * (1.0 / math.sqrt(n_embd)))
    wq, wk, wv, wo = (init(k) for k in ks[:4])
    # Scale(dim, init_scale=1, scale=n_embd**-0.5):
    #   forward = params * (1 / n_embd**-0.5).  Module init gives all-ones;
    #   perturb the params so the scale-folding path is actually exercised.
    scale_params = (n_embd ** -0.5) * (
        1.0 + 0.1 * jax.random.normal(ks[4], (n_embd,), jnp.float32))
    q_scale = scale_params / (n_embd ** -0.5)
    k_scale = q_scale   # defined in the module, unused in forward (uses q_scale)
    params = dict(wq=wq, wk=wk, wv=wv, wo=wo, q_scale=q_scale, k_scale=k_scale)
    # Precompute the fused/transposed projection weights once (not per call).
    params["w_qkv_t"] = jnp.concatenate([wq.T, wk.T, wv.T], axis=1)   # (C, 3C)
    params["wo_t"] = wo.T                                             # (C, C)
    return params


def rope_tables(T, Dh):
    # rotary-embedding-torch defaults: theta=10000, interleaved pairs
    inv_freq = 1.0 / (10000.0 ** (jnp.arange(0, Dh, 2, dtype=jnp.float32) / Dh))
    freqs = jnp.arange(T, dtype=jnp.float32)[:, None] * inv_freq[None, :]
    freqs = jnp.repeat(freqs, 2, axis=-1)                      # (T, Dh)
    # rotate_half as a matmul (only used by the pure-JAX reference):
    P = jnp.zeros((Dh, Dh), jnp.float32)
    idx = jnp.arange(0, Dh, 2)
    P = P.at[idx + 1, idx].set(-1.0)
    P = P.at[idx, idx + 1].set(1.0)
    return jnp.cos(freqs), jnp.sin(freqs), P


def build_attn_tables(T, Dh, n_heads, q_scale, sm_scale):
    """Full-width (T, C) RoPE tables with q_scale / sm_scale folded in."""
    cos, sin, _ = rope_tables(T, Dh)
    cos_full = jnp.tile(cos, (1, n_heads))                     # (T, C)
    sin_full = jnp.tile(sin, (1, n_heads))
    lane = jnp.arange(n_heads * Dh)
    sign = jnp.where(lane % 2 == 0, -1.0, 1.0)[None, :]        # swapped-term sign
    sin_signed = sin_full * sign
    qs = q_scale[None, :]      # module applies q_scale to BOTH q and k
    cos_q = cos_full * qs * sm_scale
    sin_q = sin_signed * qs * sm_scale
    cos_k = cos_full * qs
    sin_k = sin_signed * qs
    return cos_q, sin_q, cos_k, sin_k


def attention_forward(params, x, n_heads, *, matmul_dtype=None):
    """matmul_dtype=jnp.bfloat16 enables the fast MXU path on v5e/v6e/v7x."""
    B, T, C = x.shape
    Dh = C // n_heads
    dot_dtype = matmul_dtype if matmul_dtype is not None else x.dtype
    use_bf16 = matmul_dtype is not None

    # Fused q/k/v projection: one (B*T, C) @ (C, 3C) matmul.
    x2d = x.reshape(B * T, C)
    qkv = linear_pallas(x2d, params["w_qkv_t"], matmul_dtype=matmul_dtype)
    q = qkv[:, :C].reshape(B, T, C)
    k = qkv[:, C:2 * C].reshape(B, T, C)
    v = qkv[:, 2 * C:].reshape(B, T, C)

    sm_scale = 1.0 / math.sqrt(Dh)   # F.scaled_dot_product_attention default
    cos_q, sin_q, cos_k, sin_k = build_attn_tables(
        T, Dh, n_heads, params["q_scale"], sm_scale)

    # O(T) RoPE + scale pre-pass; outputs in the dot dtype (bf16 halves the
    # repeated K/V HBM traffic inside the attention kernel).
    q_r = rope_scale_pallas(q, cos_q, sin_q, out_dtype=dot_dtype)
    k_r = rope_scale_pallas(k, cos_k, sin_k, out_dtype=dot_dtype)
    v_c = v.astype(dot_dtype)

    attn = flash_attention_pallas(q_r, k_r, v_c, n_heads,
                                  out_dtype=x.dtype, dot_dtype=dot_dtype,
                                  approx_recip=use_bf16)

    # c_proj directly from the (B, T, C) attention output -- no transposes.
    out2d = linear_pallas(attn.reshape(B * T, C), params["wo_t"],
                          matmul_dtype=matmul_dtype)
    return out2d.reshape(B, T, C)


# ----------------------------------------------------------------------------
# Pure-JAX reference (for correctness check)
# ----------------------------------------------------------------------------
def attention_reference(params, x, n_heads):
    B, T, C = x.shape
    Dh = C // n_heads
    q = x @ params["wq"].T
    k = x @ params["wk"].T
    v = x @ params["wv"].T
    to_heads = lambda t: t.reshape(B, T, n_heads, Dh).transpose(0, 2, 1, 3)
    q, k, v = to_heads(q), to_heads(k), to_heads(v)
    cos, sin, P = rope_tables(T, Dh)
    rope = lambda t: t * cos + (t @ P) * sin
    q, k = rope(q), rope(k)
    qs = params["q_scale"].reshape(n_heads, 1, Dh)
    q = q * qs
    k = k * qs                      # module uses q_scale() for both q and k
    s = jnp.einsum("bhqd,bhkd->bhqk", q, k) / math.sqrt(Dh)
    mask = jnp.tril(jnp.ones((T, T), bool))
    s = jnp.where(mask, s, -jnp.inf)
    p = jax.nn.softmax(s, axis=-1)
    o = jnp.einsum("bhqk,bhkd->bhqd", p, v)
    o = o.transpose(0, 2, 1, 3).reshape(B, T, C)
    return o @ params["wo"].T


if __name__ == "__main__":
    # Small but lane-dense shapes: C = 128 (one full vreg row), dim_head = 32.
    B, T, n_embd, heads = 2, 16, 128, 4
    key = jax.random.PRNGKey(0)
    kp, kx = jax.random.split(key)
    params = make_params(kp, n_embd)
    x = jax.random.normal(kx, (B, T, n_embd), jnp.float32)

    ref = attention_reference(params, x, heads)

    # f32 path: strict correctness check.
    out = attention_forward(params, x, heads)
    out = jax.block_until_ready(out)
    assert out.shape == (B, T, n_embd)
    max_err = float(jnp.max(jnp.abs(out - ref)))
    assert jnp.allclose(out, ref, atol=1e-4, rtol=1e-4), max_err

    # bf16 MXU path (the fast configuration on v5e/v6e/v7x): loose check only.
    out_bf16 = attention_forward(params, x, heads, matmul_dtype=jnp.bfloat16)
    out_bf16 = jax.block_until_ready(out_bf16)
    assert out_bf16.shape == (B, T, n_embd)
    assert bool(jnp.all(jnp.isfinite(out_bf16)))
    max_err_bf16 = float(jnp.max(jnp.abs(out_bf16 - ref)))
    assert max_err_bf16 < 0.25, max_err_bf16

    print("KERNEL_OK")
</pallas_src>

<mosaic_0001>
module attributes {stable_mosaic.version = 11 : i64} {
  func.func @_matmul_kernel(%arg0: i32, %arg1: i32, %arg2: i32, %arg3: memref<32x128xf32, #tpu.memory_space<vmem>>, %arg4: memref<128x128xf32, #tpu.memory_space<vmem>>, %arg5: memref<32x128xf32, #tpu.memory_space<vmem>>, %arg6: memref<32x128xf32, #tpu.memory_space<vmem>>) attributes {dimension_semantics = [#tpu.dimension_semantics<parallel>, #tpu.dimension_semantics<parallel>, #tpu.dimension_semantics<arbitrary>], iteration_bounds = array<i64: 1, 3, 1>, scalar_prefetch = 0 : i64, scratch_operands = 1 : i64, tpu.core_type = #tpu.core_type<tc>, window_params = [{transform_indices = @transform_0, window_bounds = array<i64: 32, 128>}, {transform_indices = @transform_1, window_bounds = array<i64: 128, 128>}, {transform_indices = @transform_2, window_bounds = array<i64: 32, 128>}]} {
    %c0_i32 = arith.constant 0 : i32
    %0 = arith.cmpi eq, %arg2, %c0_i32 : i32
    %1 = arith.extui %0 : i1 to i32
    %c0_i32_0 = arith.constant 0 : i32
    %2 = arith.cmpi ne, %1, %c0_i32_0 : i32
    scf.if %2 {
      %cst_10 = arith.constant 0.000000e+00 : f32
      %12 = vector.broadcast %cst_10 : f32 to vector<32x128xf32>
      %c0_11 = arith.constant 0 : index
      %c0_12 = arith.constant 0 : index
      %13 = vector.load %arg6[%c0_11, %c0_12] : memref<32x128xf32, #tpu.memory_space<vmem>>, vector<32x128xf32>
      tpu.vector_store %arg6[%c0_11, %c0_12], %12 {strides = array<i32>} : memref<32x128xf32, #tpu.memory_space<vmem>>, vector<32x128xf32>,
    } else {
    }
    %c0 = arith.constant 0 : index
    %c0_1 = arith.constant 0 : index
    %3 = vector.load %arg6[%c0, %c0_1] : memref<32x128xf32, #tpu.memory_space<vmem>>, vector<32x128xf32>
    %c0_2 = arith.constant 0 : index
    %c0_3 = arith.constant 0 : index
    %4 = vector.load %arg3[%c0_2, %c0_3] : memref<32x128xf32, #tpu.memory_space<vmem>>, vector<32x128xf32>
    %c0_4 = arith.constant 0 : index
    %c0_5 = arith.constant 0 : index
    %5 = vector.load %arg4[%c0_4, %c0_5] : memref<128x128xf32, #tpu.memory_space<vmem>>, vector<128x128xf32>
    %cst = arith.constant dense<0.000000e+00> : vector<32x128xf32>
    %6 = tpu.matmul %4, %5, %cst {dimension_numbers = #tpu.dot_dimension_numbers<[1], [0], [0], [1], [0, 0, 1, 1], [], []>} : vector<32x128xf32>, vector<128x128xf32>, vector<32x128xf32> -> vector<32x128xf32>
    %7 = arith.addf %3, %6 : vector<32x128xf32>
    %c0_6 = arith.constant 0 : index
    %c0_7 = arith.constant 0 : index
    %8 = vector.load %arg6[%c0_6, %c0_7] : memref<32x128xf32, #tpu.memory_space<vmem>>, vector<32x128xf32>
    tpu.vector_store %arg6[%c0_6, %c0_7], %7 {strides = array<i32>} : memref<32x128xf32, #tpu.memory_space<vmem>>, vector<32x128xf32>,
    %c0_i32_8 = arith.constant 0 : i32
    %9 = arith.cmpi eq, %arg2, %c0_i32_8 : i32
    %10 = arith.extui %9 : i1 to i32
    %c0_i32_9 = arith.constant 0 : i32
    %11 = arith.cmpi ne, %10, %c0_i32_9 : i32
    scf.if %11 {
      %c0_10 = arith.constant 0 : index
      %c0_11 = arith.constant 0 : index
      %12 = vector.load %arg6[%c0_10, %c0_11] : memref<32x128xf32, #tpu.memory_space<vmem>>, vector<32x128xf32>
      %c0_12 = arith.constant 0 : index
      %c0_13 = arith.constant 0 : index
      %13 = vector.load %arg5[%c0_12, %c0_13] : memref<32x128xf32, #tpu.memory_space<vmem>>, vector<32x128xf32>
      tpu.vector_store %arg5[%c0_12, %c0_13], %12 {strides = array<i32>} : memref<32x128xf32, #tpu.memory_space<vmem>>, vector<32x128xf32>,
    } else {
    }
    return
  }
  func.func @transform_0(%arg0: i32, %arg1: i32, %arg2: i32) -> (i32, i32) {
    %c0_i32 = arith.constant 0 : i32
    return %arg0, %arg2 : i32, i32
  }
  func.func @transform_1(%arg0: i32, %arg1: i32, %arg2: i32) -> (i32, i32) {
    %c0_i32 = arith.constant 0 : i32
    return %arg2, %arg1 : i32, i32
  }
  func.func @transform_2(%arg0: i32, %arg1: i32, %arg2: i32) -> (i32, i32) {
    %c0_i32 = arith.constant 0 : i32
    return %arg0, %arg1 : i32, i32
  }
}

</mosaic_0001>

<bundles_post_ra>
// kernel: tpu_custom_call.1
= control target key start
LH: loop header
LB: loop body
LE: loop exit
PB: predicated region body
PF: predicated region fallthrough
CT: control target
= control target key end

     0   :  { %7 = vsyncpa [#allocation4], 0  ;;  %s1017_s0 = inlined_call_operand.hbm [shape: f32[32,128], index: 0, kind: input, shape index: {}]   ;;  %s1018_s1 = inlined_call_operand.hbm [shape: f32[128,384], index: 1, kind: input, shape index: {}]   ;;  %s1019_s2 = inlined_call_operand.hbm [shape: f32[32,384], index: 2, kind: output, shape index: {}]  }
   0x1   :  { %8 = vsyncpa [#allocation7], 0 }
   0x2   :  { %10 = vsyncpa [#allocation7 + $0x1], 0 }
   0x3   :  { %11 = vsyncpa [#allocation5], 0 }
   0x4   :  { %13 = vsyncpa [#allocation5 + $0x1], 0  ;;  %s820_s9 = smov 0   ;;  %s822_s10 = smov 0  }
   0x5   :  { %s824_s11 = smov 0   ;;  %s826_s12 = smov 0  }
   0x6   :  { %s828_s13 = smov 0   ;;  %s830_s14 = smov 0  }
   0x7 LB: > { %s472_s15 = sadd.s32 4294967295, %s794_s14   ;;  %s473_s16 = sadd.s32 4294967294, %s794_s14   ;;  %s794_s14 = sphi %s830_s14, %s19_s14   ;;  %s790_s13 = sphi %s828_s13, %s1042_s13   ;;  %s786_s12 = sphi %s826_s12, %s1041_s12   ;;  %s782_s11 = sphi %s824_s11, %s1040_s11   ;;  %s778_s10 = sphi %s822_s10, %s1039_s10   ;;  %s774_s9 = sphi %s820_s9, %s1038_s9  }
   0x8   : > { %p82_p0 = scmp.ne.s32.totalorder %s782_s11, %s778_s10  ;;  %p83_p1 = scmp.eq.s32.totalorder %s794_s14, 0 }
   0x9   : > { %p88_p2 = scmp.ne.s32.totalorder %s778_s10, %s774_s9  ;;  %p857_p3 = scmp.eq.s32.totalorder %s472_s15, 0 }
   0xa   : > { %p861_p4 = por %p83_p1, %p82_p0  ;;  %p114_p5 = scmp.eq.s32.totalorder %s472_s15, 2 }
   0xb   : > { %p867_p6 = por %p857_p3, %p88_p2  ;;  %p120_p7 = scmp.eq.s32.totalorder %s473_s16, 2 }
   0xc   : > { %p871_p8 = por %p114_p5, %p82_p0  ;;  %p474_p9 = scmp.ge.s32.totalorder %s794_s14, 1 }
   0xd   : > { %s1026_s19 = scalar_select %p867_p6, 1, 0 }
   0xe   : > { %s1027_s20 = scalar_select %p871_p8, 1, 0 }
   0xf   : > { %p876_p10 = por %p120_p7, %p88_p2  ;;  %p127_p11 = scmp.lt.s32.totalorder %s794_s14, 4 }
  0x10   : > { %s796_s23 = smov [#allocation3]   ;;  %p598_p0 = scmp.lt.s32.totalorder %s794_s14, 3 }
  0x11   : > { %s1028_s21 = scalar_select %p876_p10, 1, 0 }
  0x12   : > { %p881_p12 = pnand %p474_p9, %p127_p11  ;;  %s143_s24 = sshll.u32 %s796_s23, 4  ;;  %s144_s24 = int_to_ptr.vmem [resolvable:$true] %s143_s24 }
  0x13   : > { %1029 = sst [smem:[#allocation12_spill]] %s1028_s21  ;;  %p896_p2 = pnand %p598_p0, %p861_p4 }
  0x14   : > { %p585_p13 = pneg %p881_p12  ;;  %s34_s27 = sadd.s32 1, %s790_s13 }
  0x15   : > { %s667_s28 = scalar_lea.vmem %s144_s24, 512  ;;  %p675_p10 = scmp.lt.s32.totalorder %s144_s24, %s144_s24 }
  0x16   : > { %p890_p1 = pnand %p585_p13, %p857_p3  ;;  %p668_p7 = scmp.ne.s32.totalorder %s144_s24, %s667_s28 }
  0x17   : > { %p676_p8 = scmp.lt.s32.totalorder %s667_s28, %s667_s28 }
  0x18   : > { %p658_p5 = pneg %p890_p1 }
  0x19   : > { %p677_p6 = por %p676_p8, %p675_p10 }
  0x1a   : > { %p670_p9 = pnand %p668_p7, %p658_p5 }
  0x1c   : > { %p671_p11 = pneg %p670_p9 }
  0x1e   : > { %p678_p13 = pnand %p677_p6, %p671_p11 }
  0x20   : > { %681 = shalt.err (!%p678_p13)
}
  0x21   : > { %s1023_s29 = smov 128   ;;  %s798_s30 = smov 8  }
  0x22   : > { %588 = dma.hbm_to_vmem [thread:$0]  (!%p890_p1), %s1017_s0, 512, %s144_s24, [#allocation4], %s1023_s29, %s1023_s29, %s798_s30  }
  0x23   : > { %p36_p4 = scmp.ge.s32.totalorder %s34_s27, 3  ;;  %s75_s5 = sadd.s32 1, %s782_s11 }
  0x24   : > { %s157_s6 = sand.u32 1, %s782_s11   ;;  %s478_s15 = sshll.u32 %s790_s13, 7 }
  0x25   : > { %s1044_s27 = smov (%p36_p4, %s34_s27), 0  ;;  %s477_s7 = sshll.u32 %s157_s6, 7 }
  0x26   : > { %s71_s8 = ssub.s32 %s790_s13, %s1044_s27  ;;  %s169_s23 = scalar_lea.hbm %s1018_s1, %s478_s15 }
  0x27   : > { %p73_p6 = scmp.eq.s32.totalorder %s71_s8, 0  ;;  %s161_s25 = scalar_lea.vmem [#allocation6], %s477_s7 }
  0x28   : > { %s170_s28 = sshll.u32 %s161_s25, 4  ;;  %s158_s24 = scalar_lea.sflag [#allocation7], %s157_s6  ;;  %s171_s28 = int_to_ptr.vmem [resolvable:$true] %s170_s28 }
  0x29   : > { %s922_s21 = scalar_select %p73_p6, %s782_s11, %s75_s5  }
  0x2a   : > { %p684_p8 = pneg %p896_p2  ;;  %s695_s3 = scalar_lea.vmem %s171_s28, 2048 }
  0x2b   : > { %p696_p10 = scmp.ne.s32.totalorder %s171_s28, %s695_s3  ;;  %s799_s4 = smov [#allocation6]  }
  0x2c   : > { %s700_s29 = sshll.u32 %s799_s4, 4  ;;  %s701_s29 = int_to_ptr.vmem [resolvable:$false] %s700_s29 }
  0x2d   : > { %p698_p0 = pnand %p696_p10, %p684_p8  ;;  %s702_s8 = scalar_lea.vmem %s701_s29, 4096 }
  0x2e   : > { %p703_p5 = scmp.lt.s32.totalorder %s171_s28, %s701_s29  ;;  %p704_p7 = scmp.lt.s32.totalorder %s702_s8, %s695_s3 }
  0x2f   : > { %p699_p1 = pneg %p698_p0 }
  0x30   : > { %p705_p9 = por %p704_p7, %p703_p5 }
  0x32   : > { %p706_p11 = pnand %p705_p9, %p699_p1 }
  0x34   : > { %709 = shalt.err (!%p706_p11)
}
  0x35   : > { %s800_s7 = smov 384   ;;  %s1033_s5 = smov 128  }
  0x36   : > { %592 = dma.hbm_to_vmem [thread:$0]  (!%p896_p2), %s169_s23, 2048, %s171_s28, %s158_s24, %s800_s7, %s1033_s5, %s798_s30  }
  0x37   : > { %182 = sbr.rel (%p881_p12) target bundleno = 309 (0x135), region = 28 }
  0x3c   : > { %761 = dma.done.wait (%p857_p3), [#allocation4], 512  }
  0x3d   : > { %763 = vsyncadd (%p857_p3), [#allocation4], 4294966784  ;;  %s937_s29 = sand.u32 1, %s778_s10   ;;  %p1034_p2 = scmp.ne.s32.totalorder %s1026_s19, 0 }
  0x3e   : > { %s481_s6 = sshll.u32 %s937_s29, 7  ;;  %s189_s26 = scalar_lea.sflag [#allocation7], %s937_s29 }
  0x3f   : > { %s941_s15 = scalar_lea.vmem [#allocation6], %s481_s6 }
  0x40   : > { %765 = dma.done.wait (%p1034_p2), %s189_s26, 2048  }
  0x41   : > { %767 = vsyncadd (%p1034_p2), %s189_s26, 4294965248  ;;  %v247_v0 = vld [vmem:[%s941_s15 + $0x78] sm:$0xff]  ;;  %v246_v1 = vld [vmem:[%s941_s15 + $0x70] sm:$0xff]  ;;  %s482_s17 = sshll.u32 %s937_s29, 5  ;;  %s484_s30 = sshll.u32 %s786_s12, 7 }
  0x42   : > { %507 = vmatprep.subr.mxu0 %v247_v0  ;;  %545 = vmatprep.subr.mxu1 %v247_v0  ;;  %v245_v2 = vld [vmem:[%s941_s15 + $0x68] sm:$0xff]  ;;  %v244_v3 = vld [vmem:[%s941_s15 + $0x60] sm:$0xff]  ;;  %v243_v4 = vld [vmem:[%s941_s15 + $0x58] sm:$0xff]  ;;  %s212_s19 = scalar_lea.vmem [#allocation8], %s482_s17  ;;  %s970_s23 = scalar_lea.hbm %s1019_s2, %s484_s30 }
  0x43   : > { %508 = vmatpush3.msra.mxu0 %v247_v0  ;;  %561 = vmatpush3.msra.mxu1 %v247_v0  ;;  %v242_v5 = vld [vmem:[%s941_s15 + $0x50] sm:$0xff]  ;;  %v241_v6 = vld [vmem:[%s941_s15 + $0x48] sm:$0xff]  ;;  %v240_v7 = vld [vmem:[%s941_s15 + $0x40] sm:$0xff]  ;;  %s368_s22 = sshll.u32 %s212_s19, 4  ;;  %s353_s25 = scalar_lea.sflag [#allocation5], %s937_s29  ;;  %s965_s22 = int_to_ptr.vmem [resolvable:$true] %s368_s22 }
  0x44   : > { %509 = vmatprep.subr.mxu0 %v246_v1  ;;  %546 = vmatprep.subr.mxu1 %v246_v1  ;;  %v239_v8 = vld [vmem:[%s941_s15 + $0x38] sm:$0xff]  ;;  %v238_v9 = vld [vmem:[%s941_s15 + $0x30] sm:$0xff]  ;;  %v237_v10 = vld [vmem:[%s941_s15 + $0x28] sm:$0xff]  ;;  %s710_s12 = scalar_lea.vmem %s965_s22, 512  ;;  %p1035_p12 = scmp.ne.s32.totalorder %s1027_s20, 0 }
  0x45   : > { %510 = vmatpush3.msra.mxu0 %v246_v1  ;;  %562 = vmatpush3.msra.mxu1 %v246_v1  ;;  %v236_v11 = vld [vmem:[%s941_s15 + $0x20] sm:$0xff]  ;;  %v235_v12 = vld [vmem:[%s941_s15 + $0x18] sm:$0xff]  ;;  %v234_v13 = vld [vmem:[%s941_s15 + $0x10] sm:$0xff]  ;;  %p711_p3 = scmp.ne.s32.totalorder %s965_s22, %s710_s12  ;;  %s801_s28 = smov [#allocation8]  }
  0x46   : > { %511 = vmatprep.subr.mxu0 %v245_v2  ;;  %547 = vmatprep.subr.mxu1 %v245_v2  ;;  %v233_v14 = vld [vmem:[%s941_s15 + $0x8] sm:$0xff]  ;;  %v232_v15 = vld [vmem:[%s941_s15] sm:$0xff]  ;;  %v230_v17 = vld [vmem:[#allocation3 + $0x10] sm:$0xff]  ;;  %s714_s24 = sshll.u32 %s801_s28, 4  ;;  %s715_s24 = int_to_ptr.vmem [resolvable:$false] %s714_s24 }
  0x47   : > { %512 = vmatpush3.msra.mxu0 %v245_v2  ;;  %563 = vmatpush3.msra.mxu1 %v245_v2  ;;  %v228_v16 = vld [vmem:[#allocation3] sm:$0xff]  ;;  %v229_v18 = vld [vmem:[#allocation3 + $0x8] sm:$0xff]  ;;  %v231_v19 = vld [vmem:[#allocation3 + $0x18] sm:$0xff]  ;;  %p712_p13 = pnand %p711_p3, %p1035_p12  ;;  %s716_s3 = scalar_lea.vmem %s715_s24, 1024 }
  0x48   : > { %513 = vmatprep.subr.mxu0 %v244_v3  ;;  %548 = vmatprep.subr.mxu1 %v244_v3  ;;  %p717_p6 = scmp.lt.s32.totalorder %s965_s22, %s715_s24  ;;  %p718_p8 = scmp.lt.s32.totalorder %s716_s3, %s710_s12 }
  0x49   : > { %514 = vmatpush3.msra.mxu0 %v244_v3  ;;  %564 = vmatpush3.msra.mxu1 %v244_v3  ;;  %p713_p4 = pneg %p712_p13 }
  0x4a   : > { %515 = vmatprep.subr.mxu0 %v243_v4  ;;  %549 = vmatprep.subr.mxu1 %v243_v4  ;;  %p719_p10 = por %p718_p8, %p717_p6 }
  0x4b   : > { %516 = vmatpush3.msra.mxu0 %v243_v4  ;;  %565 = vmatpush3.msra.mxu1 %v243_v4 }
  0x4c   : > { %517 = vmatprep.subr.mxu0 %v242_v5  ;;  %550 = vmatprep.subr.mxu1 %v242_v5  ;;  %p720_p0 = pnand %p719_p10, %p713_p4 }
  0x4d   : > { %518 = vmatpush3.msra.mxu0 %v242_v5  ;;  %566 = vmatpush3.msra.mxu1 %v242_v5 }
  0x4e   : > { %519 = vmatprep.subr.mxu0 %v241_v6  ;;  %551 = vmatprep.subr.mxu1 %v241_v6 }
  0x4f   : > { %520 = vmatpush3.msra.mxu0 %v241_v6  ;;  %567 = vmatpush3.msra.mxu1 %v241_v6 }
  0x50   : > { %521 = vmatprep.subr.mxu0 %v240_v7  ;;  %552 = vmatprep.subr.mxu1 %v240_v7 }
  0x51   : > { %522 = vmatpush3.msra.mxu0 %v240_v7  ;;  %568 = vmatpush3.msra.mxu1 %v240_v7 }
  0x52   : > { %523 = vmatprep.subr.mxu0 %v239_v8  ;;  %553 = vmatprep.subr.mxu1 %v239_v8 }
  0x53   : > { %524 = vmatpush3.msra.mxu0 %v239_v8  ;;  %569 = vmatpush3.msra.mxu1 %v239_v8 }
  0x54   : > { %525 = vmatprep.subr.mxu0 %v238_v9  ;;  %554 = vmatprep.subr.mxu1 %v238_v9 }
  0x55   : > { %526 = vmatpush3.msra.mxu0 %v238_v9  ;;  %570 = vmatpush3.msra.mxu1 %v238_v9 }
  0x56   : > { %527 = vmatprep.subr.mxu0 %v237_v10  ;;  %555 = vmatprep.subr.mxu1 %v237_v10 }
  0x57   : > { %528 = vmatpush3.msra.mxu0 %v237_v10  ;;  %571 = vmatpush3.msra.mxu1 %v237_v10 }
  0x58   : > { %529 = vmatprep.subr.mxu0 %v236_v11  ;;  %556 = vmatprep.subr.mxu1 %v236_v11 }
  0x59   : > { %530 = vmatpush3.msra.mxu0 %v236_v11  ;;  %572 = vmatpush3.msra.mxu1 %v236_v11 }
  0x5a   : > { %531 = vmatprep.subr.mxu0 %v235_v12  ;;  %557 = vmatprep.subr.mxu1 %v235_v12 }
  0x5b   : > { %532 = vmatpush3.msra.mxu0 %v235_v12  ;;  %573 = vmatpush3.msra.mxu1 %v235_v12 }
  0x5c   : > { %533 = vmatprep.subr.mxu0 %v234_v13  ;;  %558 = vmatprep.subr.mxu1 %v234_v13 }
  0x5d   : > { %534 = vmatpush3.msra.mxu0 %v234_v13  ;;  %574 = vmatpush3.msra.mxu1 %v234_v13 }
  0x5e   : > { %535 = vmatprep.subr.mxu0 %v233_v14  ;;  %559 = vmatprep.subr.mxu1 %v233_v14 }
  0x5f   : > { %536 = vmatpush3.msra.mxu0 %v233_v14  ;;  %575 = vmatpush3.msra.mxu1 %v233_v14 }
  0x60   : > { %537 = vmatprep.subr.mxu0 %v232_v15  ;;  %560 = vmatprep.subr.mxu1 %v232_v15 }
  0x61   : > { %538 = vmatpush3.msra.mxu0 %v232_v15  ;;  %576 = vmatpush3.msra.mxu1 %v232_v15 }
  0x62   : > { %539 = vmatprep.mubr.f32.mxu0 %v228_v16  ;;  %542 = vmatprep.mubr.f32.mxu1 %v230_v17 }
  0x63   : > { %540 = vmatmul.mubr.f32.vlgmr.msra.gmra.mxu0 %v229_v18  ;;  %543 = vmatmul.mubr.f32.vlgmr.msra.gmra.mxu1 %v231_v19 }
 0x123   : > { %v541_v20 = vpop.f32.mrf.mxu0  ;;  %v544_v21 = vpop.f32.mrf.mxu1 }
 0x124   : > { %349 = vst [vmem:[%s212_s19 + $0x8] sm:$0xff] %v541_v20  ;;  %351 = vst [vmem:[%s212_s19 + $0x18] sm:$0xff] %v544_v21 }
 0x125   : > { %v314_v22 = vpop.f32.mrf.mxu0  ;;  %v324_v23 = vpop.f32.mrf.mxu1 }
 0x126   : > { %348 = vst [vmem:[%s212_s19] sm:$0xff] %v314_v22  ;;  %350 = vst [vmem:[%s212_s19 + $0x10] sm:$0xff] %v324_v23 }
 0x127   : > { %723 = shalt.err (!%p720_p0)
}
 0x128   : > { %s724_s4 = scalar_lea.hbm %s970_s23, 512  ;;  %s728_s5 = scalar_lea.hbm %s1019_s2, 1536 }
 0x129   : > { %p725_p1 = scmp.ne.s32.totalorder %s970_s23, %s724_s4  ;;  %p729_p9 = scmp.lt.s32.totalorder %s970_s23, %s1019_s2 }
 0x12a   : > { %p730_p11 = scmp.lt.s32.totalorder %s728_s5, %s724_s4 }
 0x12b   : > { %p726_p5 = pnand %p725_p1, %p1035_p12 }
 0x12c   : > { %p731_p2 = por %p730_p11, %p729_p9 }
 0x12d   : > { %p727_p7 = pneg %p726_p5 }
 0x12f   : > { %p732_p3 = pnand %p731_p2, %p727_p7 }
 0x131   : > { %735 = shalt.err (!%p732_p3)
}
 0x132   : > { %s802_s15 = smov 128   ;;  %s803_s17 = smov 384  }
 0x133   : > { %s804_s19 = smov 8  }
 0x134   : > { %583 = dma.vmem_to_hbm [thread:$0]  (%p1035_p12), %s965_s22, 512, %s970_s23, %s353_s25, %s802_s15, %s803_s17, %s804_s19  }
 0x135 PF: > { %s1036_s30 = sld [smem:[#allocation12_spill]]  ;;  %p600_p13 = scmp.ge.s32.totalorder %s794_s14, 2 }
 0x136   : > { %s383_s16 = sand.u32 1, %s774_s9  }
 0x137   : > { %s384_s18 = scalar_lea.sflag [#allocation5], %s383_s16 }
 0x13b   : > { %p1037_p4 = scmp.ne.s32.totalorder %s1036_s30, 0 }
 0x13d   : > { %p594_p6 = pnand %p600_p13, %p1037_p4 }
 0x13f   : > { %p595_p8 = pneg %p594_p6 }
 0x141   : > { %769 = dma.done.wait (%p595_p8), %s384_s18, 512  }
 0x142   : > { %771 = vsyncadd (%p595_p8), %s384_s18, 4294966784  ;;  %s19_s14 = sadd.s32 1, %s794_s14   ;;  %s1038_s9 = smov %s778_s10 }
 0x143   : > { %p16_p10 = scmp.ge.s32.totalorder %s19_s14, 5   ;;  %s1039_s10 = smov %s782_s11 }
 0x144   : > { %s1040_s11 = smov %s922_s21  ;;  %s1041_s12 = smov %s790_s13 }
 0x145   : > { %s1042_s13 = smov %s1044_s27  ;;  %18 = sbr.rel (!%p16_p10) target bundleno = 7 (0x7), region = 87 }
 0x14a   :  { %389 = vsyncpa [#allocation4], 1 }
 0x14b   :  { %391 = vsyncpa [#allocation4 + $0x1], 1 }
 0x14c   :  { %392 = vsyncpa [#allocation7], 1 }
 0x14d   :  { %394 = vsyncpa [#allocation7 + $0x1], 1 }
 0x14e   :  { %395 = vsyncpa [#allocation5], 1 }
 0x14f   :  { %397 = vsyncpa [#allocation5 + $0x1], 1 }

</bundles_post_ra>
